<compile_context>
chip_gen: v7x
topology: tpu7x:2x2x1
jax: 0.10.0
libtpu: 0.0.40
codegen_flags: <defaults>
</compile_context>

<pallas_src>
import math

import jax
import jax.numpy as jnp
from jax.experimental import pallas as pl
from jax.experimental.pallas import tpu as pltpu


def _pos_embed_kernel(ty_ref, tx_ref, o_ref):
    # ty_ref: (F, h_tile, 1) precomputed y-channel table (lane-broadcast src).
    # tx_ref: (F, 1, W)      precomputed x-channel table (sublane-broadcast src).
    # o_ref : (2F, h_tile, W) output block, channel-major.
    f, ht, _ = ty_ref.shape
    w = tx_ref.shape[2]
    o_ref[0:f, :, :] = jnp.broadcast_to(ty_ref[...], (f, ht, w))
    o_ref[f:, :, :] = jnp.broadcast_to(tx_ref[...], (f, ht, w))


def _pick_h_tile(h, w, c2, itemsize, sub):
    """Rows of H per output block.

    Multiple of `sub` sublanes (so partial tail blocks are legal), capped at
    ~4 MiB per output block (double-buffered output stays well under the
    scoped-VMEM default on v5e/v6e/v7x), preferring >= 4 grid steps so v7x's
    two TensorCores each get >= 2 pipelined steps.
    """
    row_bytes = max(1, c2 * w * itemsize)
    budget = 4 * 1024 * 1024
    max_rows = max(sub, (budget // row_bytes) // sub * sub)
    pref_rows = max(sub, (h // 4) // sub * sub)
    h_tile = min(max_rows, pref_rows)
    if h_tile >= h:
        return h
    return h_tile


def position_embedding_sine(x, num_pos_feats=32, temperature=10000,
                            normalize=False, scale=None,
                            out_dtype=jnp.float32):
    """Forward of PositionEmbeddingSine. Output: (1, 2*num_pos_feats, H, W)."""
    if scale is not None and normalize is False:
        raise ValueError("normalize should be True if scale is passed")
    if scale is None:
        scale = 2 * math.pi

    h, w = int(x.shape[2]), int(x.shape[3])
    f = int(num_pos_feats)
    c2 = 2 * f

    # Per-axis embeds: cumsum of ones == index + 1 (row-major over (H, W)).
    ys = jnp.arange(1, h + 1, dtype=jnp.float32)
    xs = jnp.arange(1, w + 1, dtype=jnp.float32)
    if normalize:
        eps = 1e-6
        ys = (ys - 0.5) / (jnp.float32(h) + eps) * jnp.float32(scale)
        xs = (xs - 0.5) / (jnp.float32(w) + eps) * jnp.float32(scale)

    # dim_t with the exact reference expression (f32 arithmetic).
    dim_t = jnp.arange(f, dtype=jnp.float32)
    dim_t = jnp.float32(temperature) ** (2.0 * (dim_t // 2) / jnp.float32(f))

    # Tiny separable tables: F*(H+W) sin/cos total (exact cos for odd chans).
    arg_y = ys[None, :] / dim_t[:, None]               # (F, H)
    arg_x = xs[None, :] / dim_t[:, None]               # (F, W)
    even = (jnp.arange(f) % 2 == 0)[:, None]
    table_y = jnp.where(even, jnp.sin(arg_y), jnp.cos(arg_y)).astype(out_dtype)
    table_x = jnp.where(even, jnp.sin(arg_x), jnp.cos(arg_x)).astype(out_dtype)
    table_y = table_y.reshape(f, h, 1)                 # lane-broadcast source
    table_x = table_x.reshape(f, 1, w)                 # sublane-broadcast source

    itemsize = jnp.dtype(out_dtype).itemsize
    sub = max(8, 32 // itemsize)                       # sublane granularity
    h_tile = _pick_h_tile(h, w, c2, itemsize, sub)
    grid = (pl.cdiv(h, h_tile),)

    pos = pl.pallas_call(
        _pos_embed_kernel,
        out_shape=jax.ShapeDtypeStruct((c2, h, w), out_dtype),
        grid=grid,
        in_specs=[
            pl.BlockSpec((f, h_tile, 1), lambda i: (0, i, 0)),   # table_y
            pl.BlockSpec((f, 1, w), lambda i: (0, 0, 0)),        # table_x
        ],
        out_specs=pl.BlockSpec((c2, h_tile, w), lambda i: (0, i, 0)),
        compiler_params=pltpu.CompilerParams(
            dimension_semantics=("parallel",)),
    )(table_y, table_x)

    # (2F, H, W) -> (1, 2F, H, W): contiguous reshape, no HBM transpose.
    return pos.reshape(1, c2, h, w)


def _reference(x, num_pos_feats=32, temperature=10000, normalize=False, scale=None):
    """Pure-jnp transcription of the PyTorch forward for verification."""
    if scale is None:
        scale = 2 * math.pi
    h, w = int(x.shape[2]), int(x.shape[3])
    not_mask = jnp.ones((1, h, w), dtype=jnp.float32)
    y_embed = jnp.cumsum(not_mask, axis=1)
    x_embed = jnp.cumsum(not_mask, axis=2)
    if normalize:
        eps = 1e-6
        y_embed = (y_embed - 0.5) / (y_embed[:, -1:, :] + eps) * scale
        x_embed = (x_embed - 0.5) / (x_embed[:, :, -1:] + eps) * scale
    dim_t = jnp.arange(num_pos_feats, dtype=jnp.float32)
    dim_t = float(temperature) ** (2 * (dim_t // 2) / num_pos_feats)
    pos_x = x_embed[:, :, :, None] / dim_t
    pos_y = y_embed[:, :, :, None] / dim_t
    pos_x = jnp.stack((jnp.sin(pos_x[..., 0::2]), jnp.cos(pos_x[..., 1::2])),
                      axis=4).reshape(1, h, w, num_pos_feats)
    pos_y = jnp.stack((jnp.sin(pos_y[..., 0::2]), jnp.cos(pos_y[..., 1::2])),
                      axis=4).reshape(1, h, w, num_pos_feats)
    pos = jnp.concatenate((pos_y, pos_x), axis=3).transpose(0, 3, 1, 2)
    return pos


if __name__ == "__main__":
    key = jax.random.PRNGKey(0)
    # x values are never read by the module (only its spatial shape matters).
    x = jax.random.normal(key, (2, 4, 16, 16), dtype=jnp.float32)

    num_pos_feats = 32  # -> 64 output channels
    pos = jax.block_until_ready(
        position_embedding_sine(x, num_pos_feats=num_pos_feats))

    assert pos.shape == (1, 2 * num_pos_feats, 16, 16), pos.shape
    assert pos.dtype == jnp.float32

    ref = _reference(x, num_pos_feats=num_pos_feats)
    if not jnp.allclose(pos, ref, atol=1e-5, rtol=1e-5):
        raise SystemExit("Pallas kernel output does not match reference")

    # Also check the normalize=True path.
    pos_n = jax.block_until_ready(
        position_embedding_sine(x, num_pos_feats=num_pos_feats, normalize=True))
    ref_n = _reference(x, num_pos_feats=num_pos_feats, normalize=True)
    if not jnp.allclose(pos_n, ref_n, atol=1e-5, rtol=1e-5):
        raise SystemExit("Pallas kernel (normalize=True) does not match reference")

    print("KERNEL_OK")
</pallas_src>

<mosaic_0001>
module attributes {stable_mosaic.version = 11 : i64} {
  func.func @_pos_embed_kernel(%arg0: i32, %arg1: memref<32x8x1xf32, #tpu.memory_space<vmem>>, %arg2: memref<32x1x16xf32, #tpu.memory_space<vmem>>, %arg3: memref<64x8x16xf32, #tpu.memory_space<vmem>>) attributes {dimension_semantics = [#tpu.dimension_semantics<parallel>], iteration_bounds = array<i64: 2>, scalar_prefetch = 0 : i64, scratch_operands = 0 : i64, tpu.core_type = #tpu.core_type<tc>, window_params = [{transform_indices = @transform_0, window_bounds = array<i64: 32, 8, 1>}, {pipeline_mode = #tpu.pipeline_mode<synchronous>, transform_indices = @transform_1, window_bounds = array<i64: 32, 1, 16>}, {transform_indices = @transform_2, window_bounds = array<i64: 64, 8, 16>}]} {
    %c0 = arith.constant 0 : index
    %c0_0 = arith.constant 0 : index
    %c0_1 = arith.constant 0 : index
    %0 = vector.load %arg1[%c0, %c0_0, %c0_1] : memref<32x8x1xf32, #tpu.memory_space<vmem>>, vector<32x8x1xf32>
    %1 = vector.shape_cast %0 : vector<32x8x1xf32> to vector<32x8x1xf32>
    %2 = vector.broadcast %1 : vector<32x8x1xf32> to vector<32x8x16xf32>
    %c0_2 = arith.constant 0 : index
    %c0_3 = arith.constant 0 : index
    %c0_4 = arith.constant 0 : index
    %3 = vector.load %arg3[%c0_2, %c0_3, %c0_4] : memref<64x8x16xf32, #tpu.memory_space<vmem>>, vector<32x8x16xf32>
    tpu.vector_store %arg3[%c0_2, %c0_3, %c0_4], %2 {strides = array<i32>} : memref<64x8x16xf32, #tpu.memory_space<vmem>>, vector<32x8x16xf32>,
    %c0_5 = arith.constant 0 : index
    %c0_6 = arith.constant 0 : index
    %c0_7 = arith.constant 0 : index
    %4 = vector.load %arg2[%c0_5, %c0_6, %c0_7] : memref<32x1x16xf32, #tpu.memory_space<vmem>>, vector<32x1x16xf32>
    %5 = vector.shape_cast %4 : vector<32x1x16xf32> to vector<32x1x16xf32>
    %6 = vector.broadcast %5 : vector<32x1x16xf32> to vector<32x8x16xf32>
    %c32 = arith.constant 32 : index
    %c0_8 = arith.constant 0 : index
    %c0_9 = arith.constant 0 : index
    %7 = vector.load %arg3[%c32, %c0_8, %c0_9] : memref<64x8x16xf32, #tpu.memory_space<vmem>>, vector<32x8x16xf32>
    tpu.vector_store %arg3[%c32, %c0_8, %c0_9], %6 {strides = array<i32>} : memref<64x8x16xf32, #tpu.memory_space<vmem>>, vector<32x8x16xf32>,
    return
  }
  func.func @transform_0(%arg0: i32) -> (i32, i32, i32) {
    %c0_i32 = arith.constant 0 : i32
    %c0_i32_0 = arith.constant 0 : i32
    %c0_i32_1 = arith.constant 0 : i32
    return %c0_i32, %arg0, %c0_i32_0 : i32, i32, i32
  }
  func.func @transform_1(%arg0: i32) -> (i32, i32, i32) {
    %c0_i32 = arith.constant 0 : i32
    %c0_i32_0 = arith.constant 0 : i32
    %c0_i32_1 = arith.constant 0 : i32
    %c0_i32_2 = arith.constant 0 : i32
    return %c0_i32, %c0_i32_0, %c0_i32_1 : i32, i32, i32
  }
  func.func @transform_2(%arg0: i32) -> (i32, i32, i32) {
    %c0_i32 = arith.constant 0 : i32
    %c0_i32_0 = arith.constant 0 : i32
    %c0_i32_1 = arith.constant 0 : i32
    return %c0_i32, %arg0, %c0_i32_0 : i32, i32, i32
  }
}

</mosaic_0001>

<bundles_post_ra>
// kernel: tpu_custom_call.1
= control target key start
LH: loop header
LB: loop body
LE: loop exit
PB: predicated region body
PF: predicated region fallthrough
CT: control target
= control target key end

     0   :  { %s1271_s9 = smov 0   ;;  %s1273_s10 = smov 0   ;;  %s1793_s0 = inlined_call_operand.vmem [shape: f32[32,16,1], index: 0, kind: input, shape index: {}]   ;;  %s1794_s1 = inlined_call_operand.vmem [shape: f32[32,1,16], index: 1, kind: input, shape index: {}]   ;;  %s1795_s2 = inlined_call_operand.vmem [shape: f32[64,16,16], index: 2, kind: output, shape index: {}]  }
   0x1   :  { %s1275_s11 = smov 0  }
   0x2 LB: > { %s1127_s12 = sadd.s32 4294967295, %s1253_s11   ;;  %s1288_s13 = sadd.s32 1, %s1253_s11   ;;  %s1253_s11 = sphi %s1275_s11, %s1799_s11   ;;  %s1249_s10 = sphi %s1273_s10, %s1798_s10   ;;  %s1245_s9 = sphi %s1271_s9, %s1797_s9  }
   0x3   : > { %s16_s14 = ssub.s32 %s1253_s11, %s1288_s13  ;;  %s19_s15 = sadd.s32 1, %s1249_s10 }
   0x4   : > { %p17_p0 = scmp.eq.s32.totalorder %s16_s14, 0  ;;  %p26_p1 = scmp.ne.s32.totalorder %s1249_s10, %s1245_s9 }
   0x5   : > { %p27_p2 = scmp.eq.s32.totalorder %s1253_s11, 0  ;;  %p77_p3 = scmp.eq.s32.totalorder %s1127_s12, 1 }
   0x6   : > { %s1299_s16 = scalar_select %p17_p0, %s1249_s10, %s19_s15  }
   0x7   : > { %p28_p4 = por %p27_p2, %p26_p1  ;;  %p1301_p5 = por %p77_p3, %p26_p1 }
   0x8   : > { %p1130_p6 = scmp.ge.s32.totalorder %s1253_s11, 2 }
   0xa   : > { %102 = sbr.rel (%p1130_p6) target bundleno = 37 (0x25), region = 20 }
  0x11   : > { %105 = sbr.rel (!%p28_p4) target bundleno = 37 (0x25), region = 24  ;;  %s107_s18 = sand.u32 (%p28_p4), 1, %s1249_s10  }
  0x12   : > { %s1132_s19 = sshll.u32 (%p28_p4), %s1253_s11, 3  ;;  %s1131_s20 = sshll.u32 (%p28_p4), %s107_s18, 8 }
  0x13   : > { %s1311_s23 = scalar_lea.vmem (%p28_p4), %s1793_s0, %s1132_s19  ;;  %s1316_s24 = scalar_lea.vmem (%p28_p4), [#allocation2], %s1131_s20 }
  0x14   : > { %v201_v0 = vld [vmem:[%s1311_s23] sm:$0xff] (%p28_p4)  ;;  %v203_v1 = vld [vmem:[%s1311_s23 + $0x10] sm:$0xff] (%p28_p4) }
  0x15   : > { %v205_v2 = vld [vmem:[%s1311_s23 + $0x20] sm:$0xff] (%p28_p4)  ;;  %202 = vst [vmem:[%s1316_s24] sm:$0xff] (%p28_p4), %v201_v0  ;;  %204 = vst [vmem:[%s1316_s24 + $0x8] sm:$0xff] (%p28_p4), %v203_v1  ;;  %v207_v3 = vld [vmem:[%s1311_s23 + $0x30] sm:$0xff] (%p28_p4) }
  0x16   : > { %206 = vst [vmem:[%s1316_s24 + $0x10] sm:$0xff] (%p28_p4), %v205_v2  ;;  %v209_v4 = vld [vmem:[%s1311_s23 + $0x40] sm:$0xff] (%p28_p4)  ;;  %v211_v5 = vld [vmem:[%s1311_s23 + $0x50] sm:$0xff] (%p28_p4)  ;;  %208 = vst [vmem:[%s1316_s24 + $0x18] sm:$0xff] (%p28_p4), %v207_v3 }
  0x17   : > { %210 = vst [vmem:[%s1316_s24 + $0x20] sm:$0xff] (%p28_p4), %v209_v4  ;;  %212 = vst [vmem:[%s1316_s24 + $0x28] sm:$0xff] (%p28_p4), %v211_v5  ;;  %v213_v6 = vld [vmem:[%s1311_s23 + $0x60] sm:$0xff] (%p28_p4)  ;;  %v215_v7 = vld [vmem:[%s1311_s23 + $0x70] sm:$0xff] (%p28_p4) }
  0x18   : > { %v217_v8 = vld [vmem:[%s1311_s23 + $0x80] sm:$0xff]  ;;  %214 = vst [vmem:[%s1316_s24 + $0x30] sm:$0xff] %v213_v6  ;;  %216 = vst [vmem:[%s1316_s24 + $0x38] sm:$0xff] %v215_v7  ;;  %v219_v9 = vld [vmem:[%s1311_s23 + $0x90] sm:$0xff] }
  0x19   : > { %218 = vst [vmem:[%s1316_s24 + $0x40] sm:$0xff] %v217_v8  ;;  %v221_v10 = vld [vmem:[%s1311_s23 + $0xa0] sm:$0xff]  ;;  %v223_v11 = vld [vmem:[%s1311_s23 + $0xb0] sm:$0xff]  ;;  %220 = vst [vmem:[%s1316_s24 + $0x48] sm:$0xff] %v219_v9 }
  0x1a   : > { %222 = vst [vmem:[%s1316_s24 + $0x50] sm:$0xff] %v221_v10  ;;  %224 = vst [vmem:[%s1316_s24 + $0x58] sm:$0xff] %v223_v11  ;;  %v225_v12 = vld [vmem:[%s1311_s23 + $0xc0] sm:$0xff]  ;;  %v227_v13 = vld [vmem:[%s1311_s23 + $0xd0] sm:$0xff] }
  0x1b   : > { %v229_v14 = vld [vmem:[%s1311_s23 + $0xe0] sm:$0xff]  ;;  %226 = vst [vmem:[%s1316_s24 + $0x60] sm:$0xff] %v225_v12  ;;  %228 = vst [vmem:[%s1316_s24 + $0x68] sm:$0xff] %v227_v13  ;;  %v231_v15 = vld [vmem:[%s1311_s23 + $0xf0] sm:$0xff] }
  0x1c   : > { %230 = vst [vmem:[%s1316_s24 + $0x70] sm:$0xff] %v229_v14  ;;  %v233_v16 = vld [vmem:[%s1311_s23 + $0x100] sm:$0xff]  ;;  %v235_v17 = vld [vmem:[%s1311_s23 + $0x110] sm:$0xff]  ;;  %232 = vst [vmem:[%s1316_s24 + $0x78] sm:$0xff] %v231_v15 }
  0x1d   : > { %234 = vst [vmem:[%s1316_s24 + $0x80] sm:$0xff] %v233_v16  ;;  %236 = vst [vmem:[%s1316_s24 + $0x88] sm:$0xff] %v235_v17  ;;  %v237_v18 = vld [vmem:[%s1311_s23 + $0x120] sm:$0xff]  ;;  %v239_v19 = vld [vmem:[%s1311_s23 + $0x130] sm:$0xff] }
  0x1e   : > { %v241_v20 = vld [vmem:[%s1311_s23 + $0x140] sm:$0xff]  ;;  %238 = vst [vmem:[%s1316_s24 + $0x90] sm:$0xff] %v237_v18  ;;  %240 = vst [vmem:[%s1316_s24 + $0x98] sm:$0xff] %v239_v19  ;;  %v243_v21 = vld [vmem:[%s1311_s23 + $0x150] sm:$0xff] }
  0x1f   : > { %242 = vst [vmem:[%s1316_s24 + $0xa0] sm:$0xff] %v241_v20  ;;  %v245_v22 = vld [vmem:[%s1311_s23 + $0x160] sm:$0xff]  ;;  %v247_v23 = vld [vmem:[%s1311_s23 + $0x170] sm:$0xff]  ;;  %244 = vst [vmem:[%s1316_s24 + $0xa8] sm:$0xff] %v243_v21 }
  0x20   : > { %246 = vst [vmem:[%s1316_s24 + $0xb0] sm:$0xff] %v245_v22  ;;  %248 = vst [vmem:[%s1316_s24 + $0xb8] sm:$0xff] %v247_v23  ;;  %v249_v24 = vld [vmem:[%s1311_s23 + $0x180] sm:$0xff]  ;;  %v251_v25 = vld [vmem:[%s1311_s23 + $0x190] sm:$0xff] }
  0x21   : > { %v253_v26 = vld [vmem:[%s1311_s23 + $0x1a0] sm:$0xff]  ;;  %250 = vst [vmem:[%s1316_s24 + $0xc0] sm:$0xff] %v249_v24  ;;  %252 = vst [vmem:[%s1316_s24 + $0xc8] sm:$0xff] %v251_v25  ;;  %v255_v27 = vld [vmem:[%s1311_s23 + $0x1b0] sm:$0xff] }
  0x22   : > { %254 = vst [vmem:[%s1316_s24 + $0xd0] sm:$0xff] %v253_v26  ;;  %v257_v28 = vld [vmem:[%s1311_s23 + $0x1c0] sm:$0xff]  ;;  %v259_v29 = vld [vmem:[%s1311_s23 + $0x1d0] sm:$0xff]  ;;  %256 = vst [vmem:[%s1316_s24 + $0xd8] sm:$0xff] %v255_v27 }
  0x23   : > { %258 = vst [vmem:[%s1316_s24 + $0xe0] sm:$0xff] %v257_v28  ;;  %260 = vst [vmem:[%s1316_s24 + $0xe8] sm:$0xff] %v259_v29  ;;  %v261_v30 = vld [vmem:[%s1311_s23 + $0x1e0] sm:$0xff]  ;;  %v263_v31 = vld [vmem:[%s1311_s23 + $0x1f0] sm:$0xff] }
  0x24   : > { %262 = vst [vmem:[%s1316_s24 + $0xf0] sm:$0xff] %v261_v30  ;;  %264 = vst [vmem:[%s1316_s24 + $0xf8] sm:$0xff] %v263_v31 }
  0x25 PF: > { %p1133_p7 = scmp.ge.s32.totalorder %s1253_s11, 1  ;;  %p269_p8 = scmp.lt.s32.totalorder %s1253_s11, 3 }
  0x27   : > { %p270_p9 = pnand %p1133_p7, %p269_p8 }
  0x28   : > { %s276_s25 = sand.u32 (!%p270_p9), 1, %s1245_s9   ;;  %v1255_v32 = vmov (!%p270_p9), 0   ;;  %vm488_vm0 = vcmask (!%p270_p9), 130048   ;;  %v1136_v1 = vld [vmem:[%s1794_s1] ss:$0 sm:$0xff] (!%p270_p9) }
  0x29   : > { %273 = sbr.rel (%p270_p9) target bundleno = 241 (0xf1), region = 62  ;;  %1230 = vset.pattern.permute.xlu1 (!%p270_p9), %v1255_v32  ;;  %1229 = vset.pattern.permute.xlu0 (!%p270_p9), %v1255_v32  ;;  %s1134_s26 = sshll.u32 (!%p270_p9), %s276_s25, 8  ;;  %v1137_v2 = vld [vmem:[%s1794_s1 + $0x1] ss:$0 sm:$0xff] (!%p270_p9)  ;;  %v1138_v3 = vld [vmem:[%s1794_s1 + $0x2] ss:$0 sm:$0xff] (!%p270_p9) }
  0x2a   : > { %s1384_s27 = scalar_lea.vmem (!%p270_p9), [#allocation2], %s1134_s26  ;;  %s1135_s28 = sshll.u32 (!%p270_p9), %s276_s25, 9  ;;  %v1139_v4 = vld [vmem:[%s1794_s1 + $0x3] ss:$0 sm:$0xff] (!%p270_p9)  ;;  %v1140_v5 = vld [vmem:[%s1794_s1 + $0x4] ss:$0 sm:$0xff] (!%p270_p9) }
  0x2b   : > { %v298_v33 = vld [vmem:[%s1384_s27 + $0x10] sm:$0xff] (!%p270_p9)  ;;  %v296_v34 = vld [vmem:[%s1384_s27] sm:$0xff] (!%p270_p9)  ;;  %v299_v35 = vld [vmem:[%s1384_s27 + $0x18] sm:$0xff] (!%p270_p9)  ;;  %s1438_s19 = scalar_lea.vmem (!%p270_p9), [#allocation3], %s1135_s28 }
  0x2c   : > { %340 = vperm.xlu1 (!%p270_p9), %1230, %v298_v33   ;;  %330 = vperm.xlu0 (!%p270_p9), %1229, %v296_v34   ;;  %v297_v36 = vld [vmem:[%s1384_s27 + $0x8] sm:$0xff] (!%p270_p9)  ;;  %v300_v38 = vld [vmem:[%s1384_s27 + $0x20] sm:$0xff] (!%p270_p9)  ;;  %v303_v39 = vld [vmem:[%s1384_s27 + $0x38] sm:$0xff] (!%p270_p9)  ;;  %1168 = vst.msk [vmem:[%s1438_s19 + $0x100] sm:$0xff] (!%p270_p9), %vm488_vm0, %v1136_v1 }
  0x2d   : > { %v301_v37 = vld [vmem:[%s1384_s27 + $0x28] sm:$0xff] (!%p270_p9)  ;;  %v302_v40 = vld [vmem:[%s1384_s27 + $0x30] sm:$0xff] (!%p270_p9)  ;;  %v304_v42 = vld [vmem:[%s1384_s27 + $0x40] sm:$0xff] (!%p270_p9)  ;;  %1169 = vst.msk [vmem:[%s1438_s19 + $0x108] sm:$0xff] (!%p270_p9), %vm488_vm0, %v1137_v2 }
  0x2e   : > { %v305_v41 = vld [vmem:[%s1384_s27 + $0x48] sm:$0xff] (!%p270_p9)  ;;  %v307_v43 = vld [vmem:[%s1384_s27 + $0x58] sm:$0xff] (!%p270_p9)  ;;  %v306_v44 = vld [vmem:[%s1384_s27 + $0x50] sm:$0xff] (!%p270_p9)  ;;  %1170 = vst.msk [vmem:[%s1438_s19 + $0x110] sm:$0xff] (!%p270_p9), %vm488_vm0, %v1138_v3 }
  0x2f   : > { %v309_v45 = vld [vmem:[%s1384_s27 + $0x68] sm:$0xff] (!%p270_p9)  ;;  %v308_v46 = vld [vmem:[%s1384_s27 + $0x60] sm:$0xff] (!%p270_p9)  ;;  %v311_v47 = vld [vmem:[%s1384_s27 + $0x78] sm:$0xff] (!%p270_p9)  ;;  %1171 = vst.msk [vmem:[%s1438_s19 + $0x118] sm:$0xff] (!%p270_p9), %vm488_vm0, %v1139_v4 }
  0x30   : > { %345 = vperm.xlu1 %1230, %v299_v35   ;;  %335 = vperm.xlu0 %1229, %v297_v36   ;;  %v310_v48 = vld [vmem:[%s1384_s27 + $0x70] sm:$0xff]  ;;  %v313_v49 = vld [vmem:[%s1384_s27 + $0x88] sm:$0xff]  ;;  %v312_v50 = vld [vmem:[%s1384_s27 + $0x80] sm:$0xff]  ;;  %1172 = vst.msk [vmem:[%s1438_s19 + $0x120] sm:$0xff] %vm488_vm0, %v1140_v5  ;;  %s1201_s30 = sshll.u32 (%p1301_p5), %s1127_s12, 3 }
  0x31   : > { %v315_v51 = vld [vmem:[%s1384_s27 + $0x98] sm:$0xff]  ;;  %v314_v52 = vld [vmem:[%s1384_s27 + $0x90] sm:$0xff]  ;;  %v317_v53 = vld [vmem:[%s1384_s27 + $0xa8] sm:$0xff]  ;;  %s1656_s17 = scalar_lea.vmem (%p1301_p5), %s1795_s2, %s1201_s30 }
  0x32   : > { %v316_v54 = vld [vmem:[%s1384_s27 + $0xa0] sm:$0xff]  ;;  %v319_v55 = vld [vmem:[%s1384_s27 + $0xb8] sm:$0xff]  ;;  %v318_v56 = vld [vmem:[%s1384_s27 + $0xb0] sm:$0xff] }
  0x33   : > { %v321_v57 = vld [vmem:[%s1384_s27 + $0xc8] sm:$0xff]  ;;  %v320_v58 = vld [vmem:[%s1384_s27 + $0xc0] sm:$0xff]  ;;  %v323_v59 = vld [vmem:[%s1384_s27 + $0xd8] sm:$0xff] }
  0x34   : > { %355 = vperm.xlu1 %1230, %v301_v37   ;;  %350 = vperm.xlu0 %1229, %v300_v38   ;;  %v322_v60 = vld [vmem:[%s1384_s27 + $0xd0] sm:$0xff]  ;;  %v325_v61 = vld [vmem:[%s1384_s27 + $0xe8] sm:$0xff]  ;;  %v324_v62 = vld [vmem:[%s1384_s27 + $0xe0] sm:$0xff] }
  0x35   : > { %v327_v63 = vld [vmem:[%s1384_s27 + $0xf8] sm:$0xff]  ;;  %v326_v0 = vld [vmem:[%s1384_s27 + $0xf0] sm:$0xff]  ;;  %v1141_v6 = vld [vmem:[%s1794_s1 + $0x5] ss:$0 sm:$0xff] }
  0x36   : > { %v1142_v7 = vld [vmem:[%s1794_s1 + $0x6] ss:$0 sm:$0xff]  ;;  %v1143_v8 = vld [vmem:[%s1794_s1 + $0x7] ss:$0 sm:$0xff]  ;;  %v1144_v9 = vld [vmem:[%s1794_s1 + $0x8] ss:$0 sm:$0xff] }
  0x37   : > { %1173 = vst.msk [vmem:[%s1438_s19 + $0x128] sm:$0xff] %vm488_vm0, %v1141_v6  ;;  %v1145_v10 = vld [vmem:[%s1794_s1 + $0x9] ss:$0 sm:$0xff]  ;;  %v1146_v11 = vld [vmem:[%s1794_s1 + $0xa] ss:$0 sm:$0xff]  ;;  %1174 = vst.msk [vmem:[%s1438_s19 + $0x130] sm:$0xff] %vm488_vm0, %v1142_v7 }
  0x38   : > { %365 = vperm.xlu1 %1230, %v303_v39   ;;  %360 = vperm.xlu0 %1229, %v302_v40   ;;  %v1147_v12 = vld [vmem:[%s1794_s1 + $0xb] ss:$0 sm:$0xff]  ;;  %1175 = vst.msk [vmem:[%s1438_s19 + $0x138] sm:$0xff] %vm488_vm0, %v1143_v8  ;;  %1176 = vst.msk [vmem:[%s1438_s19 + $0x140] sm:$0xff] %vm488_vm0, %v1144_v9  ;;  %v1148_v13 = vld [vmem:[%s1794_s1 + $0xc] ss:$0 sm:$0xff] }
  0x39   : > { %v1149_v14 = vld [vmem:[%s1794_s1 + $0xd] ss:$0 sm:$0xff]  ;;  %v1150_v15 = vld [vmem:[%s1794_s1 + $0xe] ss:$0 sm:$0xff]  ;;  %1177 = vst.msk [vmem:[%s1438_s19 + $0x148] sm:$0xff] %vm488_vm0, %v1145_v10  ;;  %1178 = vst.msk [vmem:[%s1438_s19 + $0x150] sm:$0xff] %vm488_vm0, %v1146_v11 }
  0x3a   : > { %1179 = vst.msk [vmem:[%s1438_s19 + $0x158] sm:$0xff] %vm488_vm0, %v1147_v12  ;;  %v1151_v16 = vld [vmem:[%s1794_s1 + $0xf] ss:$0 sm:$0xff]  ;;  %v1152_v17 = vld [vmem:[%s1794_s1 + $0x10] ss:$0 sm:$0xff]  ;;  %1180 = vst.msk [vmem:[%s1438_s19 + $0x160] sm:$0xff] %vm488_vm0, %v1148_v13 }
  0x3b   : > { %v1153_v18 = vld [vmem:[%s1794_s1 + $0x11] ss:$0 sm:$0xff]  ;;  %1181 = vst.msk [vmem:[%s1438_s19 + $0x168] sm:$0xff] %vm488_vm0, %v1149_v14  ;;  %1182 = vst.msk [vmem:[%s1438_s19 + $0x170] sm:$0xff] %vm488_vm0, %v1150_v15  ;;  %v1154_v19 = vld [vmem:[%s1794_s1 + $0x12] ss:$0 sm:$0xff] }
  0x3c   : > { %375 = vperm.xlu1 %1230, %v305_v41   ;;  %370 = vperm.xlu0 %1229, %v304_v42   ;;  %v1155_v20 = vld [vmem:[%s1794_s1 + $0x13] ss:$0 sm:$0xff]  ;;  %v1156_v21 = vld [vmem:[%s1794_s1 + $0x14] ss:$0 sm:$0xff]  ;;  %1183 = vst.msk [vmem:[%s1438_s19 + $0x178] sm:$0xff] %vm488_vm0, %v1151_v16  ;;  %1184 = vst.msk [vmem:[%s1438_s19 + $0x180] sm:$0xff] %vm488_vm0, %v1152_v17 }
  0x3d   : > { %1185 = vst.msk [vmem:[%s1438_s19 + $0x188] sm:$0xff] %vm488_vm0, %v1153_v18  ;;  %v1157_v22 = vld [vmem:[%s1794_s1 + $0x15] ss:$0 sm:$0xff]  ;;  %v1158_v23 = vld [vmem:[%s1794_s1 + $0x16] ss:$0 sm:$0xff]  ;;  %1186 = vst.msk [vmem:[%s1438_s19 + $0x190] sm:$0xff] %vm488_vm0, %v1154_v19 }
  0x3e   : > { %v1159_v24 = vld [vmem:[%s1794_s1 + $0x17] ss:$0 sm:$0xff]  ;;  %1187 = vst.msk [vmem:[%s1438_s19 + $0x198] sm:$0xff] %vm488_vm0, %v1155_v20  ;;  %1188 = vst.msk [vmem:[%s1438_s19 + $0x1a0] sm:$0xff] %vm488_vm0, %v1156_v21  ;;  %v1160_v25 = vld [vmem:[%s1794_s1 + $0x18] ss:$0 sm:$0xff] }
  0x3f   : > { %v1161_v26 = vld [vmem:[%s1794_s1 + $0x19] ss:$0 sm:$0xff]  ;;  %v1162_v27 = vld [vmem:[%s1794_s1 + $0x1a] ss:$0 sm:$0xff]  ;;  %1189 = vst.msk [vmem:[%s1438_s19 + $0x1a8] sm:$0xff] %vm488_vm0, %v1157_v22  ;;  %1190 = vst.msk [vmem:[%s1438_s19 + $0x1b0] sm:$0xff] %vm488_vm0, %v1158_v23 }
  0x40   : > { %385 = vperm.xlu1 %1230, %v307_v43   ;;  %380 = vperm.xlu0 %1229, %v306_v44   ;;  %1191 = vst.msk [vmem:[%s1438_s19 + $0x1b8] sm:$0xff] %vm488_vm0, %v1159_v24  ;;  %v1163_v28 = vld [vmem:[%s1794_s1 + $0x1b] ss:$0 sm:$0xff]  ;;  %v1164_v29 = vld [vmem:[%s1794_s1 + $0x1c] ss:$0 sm:$0xff]  ;;  %1192 = vst.msk [vmem:[%s1438_s19 + $0x1c0] sm:$0xff] %vm488_vm0, %v1160_v25 }
  0x41   : > { %v1165_v30 = vld [vmem:[%s1794_s1 + $0x1d] ss:$0 sm:$0xff]  ;;  %1193 = vst.msk [vmem:[%s1438_s19 + $0x1c8] sm:$0xff] %vm488_vm0, %v1161_v26  ;;  %1194 = vst.msk [vmem:[%s1438_s19 + $0x1d0] sm:$0xff] %vm488_vm0, %v1162_v27  ;;  %v1166_v31 = vld [vmem:[%s1794_s1 + $0x1e] ss:$0 sm:$0xff] }
  0x42   : > { %v1167_v32 = vld [vmem:[%s1794_s1 + $0x1f] ss:$0 sm:$0xff]  ;;  %1195 = vst.msk [vmem:[%s1438_s19 + $0x1d8] sm:$0xff] %vm488_vm0, %v1163_v28  ;;  %1196 = vst.msk [vmem:[%s1438_s19 + $0x1e0] sm:$0xff] %vm488_vm0, %v1164_v29 }
  0x43   : > { %1197 = vst.msk [vmem:[%s1438_s19 + $0x1e8] sm:$0xff] %vm488_vm0, %v1165_v30  ;;  %1198 = vst.msk [vmem:[%s1438_s19 + $0x1f0] sm:$0xff] %vm488_vm0, %v1166_v31 }
  0x44   : > { %395 = vperm.xlu1 %1230, %v309_v45   ;;  %390 = vperm.xlu0 %1229, %v308_v46   ;;  %1199 = vst.msk [vmem:[%s1438_s19 + $0x1f8] sm:$0xff] %vm488_vm0, %v1167_v32 }
  0x48   : > { %405 = vperm.xlu1 %1230, %v311_v47   ;;  %400 = vperm.xlu0 %1229, %v310_v48  }
  0x4c   : > { %415 = vperm.xlu1 %1230, %v313_v49   ;;  %410 = vperm.xlu0 %1229, %v312_v50  }
  0x50   : > { %425 = vperm.xlu1 %1230, %v315_v51   ;;  %420 = vperm.xlu0 %1229, %v314_v52  }
  0x54   : > { %435 = vperm.xlu1 %1230, %v317_v53   ;;  %430 = vperm.xlu0 %1229, %v316_v54  }
  0x58   : > { %445 = vperm.xlu1 %1230, %v319_v55   ;;  %440 = vperm.xlu0 %1229, %v318_v56  }
  0x5c   : > { %455 = vperm.xlu1 %1230, %v321_v57   ;;  %450 = vperm.xlu0 %1229, %v320_v58  }
  0x60   : > { %465 = vperm.xlu1 %1230, %v323_v59   ;;  %460 = vperm.xlu0 %1229, %v322_v60  }
  0x64   : > { %475 = vperm.xlu1 %1230, %v325_v61   ;;  %470 = vperm.xlu0 %1229, %v324_v62  }
  0x68   : > { %485 = vperm.xlu1 %1230, %v327_v63   ;;  %480 = vperm.xlu0 %1229, %v326_v0  }
  0xab   : > { %v341_v33 = vpop.permute.xlu1 %340  ;;  %v331_v34 = vpop.permute.xlu0 %330 }
  0xac   : > { %491 = vst.msk [vmem:[%s1438_s19 + $0x10] sm:$0xff] %vm488_vm0, %v341_v33  ;;  %489 = vst.msk [vmem:[%s1438_s19] sm:$0xff] %vm488_vm0, %v331_v34  ;;  %v1004_v33 = vld [vmem:[%s1438_s19 + $0x100] sm:$0xff] (%p1301_p5)  ;;  %v1006_v34 = vld [vmem:[%s1438_s19 + $0x108] sm:$0xff] (%p1301_p5) }
  0xad   : > { %1005 = vst [vmem:[%s1656_s17 + $0x200] sm:$0xff] (%p1301_p5), %v1004_v33  ;;  %1007 = vst [vmem:[%s1656_s17 + $0x210] sm:$0xff] (%p1301_p5), %v1006_v34 }
  0xaf   : > { %v346_v35 = vpop.permute.xlu1 %345  ;;  %v336_v36 = vpop.permute.xlu0 %335 }
  0xb0   : > { %492 = vst.msk [vmem:[%s1438_s19 + $0x18] sm:$0xff] %vm488_vm0, %v346_v35  ;;  %490 = vst.msk [vmem:[%s1438_s19 + $0x8] sm:$0xff] %vm488_vm0, %v336_v36  ;;  %v1008_v35 = vld [vmem:[%s1438_s19 + $0x110] sm:$0xff] (%p1301_p5)  ;;  %v1010_v36 = vld [vmem:[%s1438_s19 + $0x118] sm:$0xff] (%p1301_p5) }
  0xb1   : > { %1009 = vst [vmem:[%s1656_s17 + $0x220] sm:$0xff] (%p1301_p5), %v1008_v35  ;;  %1011 = vst [vmem:[%s1656_s17 + $0x230] sm:$0xff] (%p1301_p5), %v1010_v36 }
  0xb3   : > { %v356_v37 = vpop.permute.xlu1 %355  ;;  %v351_v38 = vpop.permute.xlu0 %350  ;;  %v940_v1 = vld [vmem:[%s1438_s19] sm:$0xff] (%p1301_p5)  ;;  %v944_v3 = vld [vmem:[%s1438_s19 + $0x10] sm:$0xff] (%p1301_p5) }
  0xb4   : > { %494 = vst.msk [vmem:[%s1438_s19 + $0x28] sm:$0xff] %vm488_vm0, %v356_v37  ;;  %493 = vst.msk [vmem:[%s1438_s19 + $0x20] sm:$0xff] %vm488_vm0, %v351_v38  ;;  %v1012_v37 = vld [vmem:[%s1438_s19 + $0x120] sm:$0xff] (%p1301_p5)  ;;  %v1014_v38 = vld [vmem:[%s1438_s19 + $0x128] sm:$0xff] (%p1301_p5) }
  0xb5   : > { %941 = vst [vmem:[%s1656_s17] sm:$0xff] (%p1301_p5), %v940_v1  ;;  %945 = vst [vmem:[%s1656_s17 + $0x20] sm:$0xff] (%p1301_p5), %v944_v3 }
  0xb6   : > { %1013 = vst [vmem:[%s1656_s17 + $0x240] sm:$0xff] (%p1301_p5), %v1012_v37  ;;  %1015 = vst [vmem:[%s1656_s17 + $0x250] sm:$0xff] (%p1301_p5), %v1014_v38 }
  0xb7   : > { %v366_v39 = vpop.permute.xlu1 %365  ;;  %v361_v40 = vpop.permute.xlu0 %360  ;;  %v942_v2 = vld [vmem:[%s1438_s19 + $0x8] sm:$0xff] (%p1301_p5)  ;;  %v946_v4 = vld [vmem:[%s1438_s19 + $0x18] sm:$0xff] (%p1301_p5) }
  0xb8   : > { %496 = vst.msk [vmem:[%s1438_s19 + $0x38] sm:$0xff] %vm488_vm0, %v366_v39  ;;  %495 = vst.msk [vmem:[%s1438_s19 + $0x30] sm:$0xff] %vm488_vm0, %v361_v40  ;;  %v1016_v39 = vld [vmem:[%s1438_s19 + $0x130] sm:$0xff] (%p1301_p5)  ;;  %v1018_v40 = vld [vmem:[%s1438_s19 + $0x138] sm:$0xff] (%p1301_p5) }
  0xb9   : > { %943 = vst [vmem:[%s1656_s17 + $0x10] sm:$0xff] (%p1301_p5), %v942_v2  ;;  %947 = vst [vmem:[%s1656_s17 + $0x30] sm:$0xff] (%p1301_p5), %v946_v4 }
  0xba   : > { %1017 = vst [vmem:[%s1656_s17 + $0x260] sm:$0xff] (%p1301_p5), %v1016_v39  ;;  %1019 = vst [vmem:[%s1656_s17 + $0x270] sm:$0xff] (%p1301_p5), %v1018_v40 }
  0xbb   : > { %v376_v41 = vpop.permute.xlu1 %375  ;;  %v371_v42 = vpop.permute.xlu0 %370  ;;  %v948_v5 = vld [vmem:[%s1438_s19 + $0x20] sm:$0xff] (%p1301_p5)  ;;  %v950_v6 = vld [vmem:[%s1438_s19 + $0x28] sm:$0xff] (%p1301_p5) }
  0xbc   : > { %498 = vst.msk [vmem:[%s1438_s19 + $0x48] sm:$0xff] %vm488_vm0, %v376_v41  ;;  %497 = vst.msk [vmem:[%s1438_s19 + $0x40] sm:$0xff] %vm488_vm0, %v371_v42  ;;  %v1020_v41 = vld [vmem:[%s1438_s19 + $0x140] sm:$0xff] (%p1301_p5)  ;;  %v1022_v42 = vld [vmem:[%s1438_s19 + $0x148] sm:$0xff] (%p1301_p5) }
  0xbd   : > { %949 = vst [vmem:[%s1656_s17 + $0x40] sm:$0xff] (%p1301_p5), %v948_v5  ;;  %951 = vst [vmem:[%s1656_s17 + $0x50] sm:$0xff] (%p1301_p5), %v950_v6 }
  0xbe   : > { %1021 = vst [vmem:[%s1656_s17 + $0x280] sm:$0xff] (%p1301_p5), %v1020_v41  ;;  %1023 = vst [vmem:[%s1656_s17 + $0x290] sm:$0xff] (%p1301_p5), %v1022_v42 }
  0xbf   : > { %v386_v43 = vpop.permute.xlu1 %385  ;;  %v381_v44 = vpop.permute.xlu0 %380  ;;  %v952_v7 = vld [vmem:[%s1438_s19 + $0x30] sm:$0xff] (%p1301_p5)  ;;  %v954_v8 = vld [vmem:[%s1438_s19 + $0x38] sm:$0xff] (%p1301_p5) }
  0xc0   : > { %500 = vst.msk [vmem:[%s1438_s19 + $0x58] sm:$0xff] %vm488_vm0, %v386_v43  ;;  %499 = vst.msk [vmem:[%s1438_s19 + $0x50] sm:$0xff] %vm488_vm0, %v381_v44  ;;  %v1024_v43 = vld [vmem:[%s1438_s19 + $0x150] sm:$0xff] (%p1301_p5)  ;;  %v1026_v44 = vld [vmem:[%s1438_s19 + $0x158] sm:$0xff] (%p1301_p5) }
  0xc1   : > { %953 = vst [vmem:[%s1656_s17 + $0x60] sm:$0xff] (%p1301_p5), %v952_v7  ;;  %955 = vst [vmem:[%s1656_s17 + $0x70] sm:$0xff] (%p1301_p5), %v954_v8 }
  0xc2   : > { %1025 = vst [vmem:[%s1656_s17 + $0x2a0] sm:$0xff] (%p1301_p5), %v1024_v43  ;;  %1027 = vst [vmem:[%s1656_s17 + $0x2b0] sm:$0xff] (%p1301_p5), %v1026_v44 }
  0xc3   : > { %v396_v45 = vpop.permute.xlu1 %395  ;;  %v391_v46 = vpop.permute.xlu0 %390  ;;  %v956_v9 = vld [vmem:[%s1438_s19 + $0x40] sm:$0xff] (%p1301_p5)  ;;  %v958_v10 = vld [vmem:[%s1438_s19 + $0x48] sm:$0xff] (%p1301_p5) }
  0xc4   : > { %502 = vst.msk [vmem:[%s1438_s19 + $0x68] sm:$0xff] %vm488_vm0, %v396_v45  ;;  %501 = vst.msk [vmem:[%s1438_s19 + $0x60] sm:$0xff] %vm488_vm0, %v391_v46  ;;  %v1028_v45 = vld [vmem:[%s1438_s19 + $0x160] sm:$0xff] (%p1301_p5)  ;;  %v1030_v46 = vld [vmem:[%s1438_s19 + $0x168] sm:$0xff] (%p1301_p5) }
  0xc5   : > { %957 = vst [vmem:[%s1656_s17 + $0x80] sm:$0xff] (%p1301_p5), %v956_v9  ;;  %959 = vst [vmem:[%s1656_s17 + $0x90] sm:$0xff] (%p1301_p5), %v958_v10 }
  0xc6   : > { %1029 = vst [vmem:[%s1656_s17 + $0x2c0] sm:$0xff] (%p1301_p5), %v1028_v45  ;;  %1031 = vst [vmem:[%s1656_s17 + $0x2d0] sm:$0xff] (%p1301_p5), %v1030_v46 }
  0xc7   : > { %v406_v47 = vpop.permute.xlu1 %405  ;;  %v401_v48 = vpop.permute.xlu0 %400  ;;  %v960_v11 = vld [vmem:[%s1438_s19 + $0x50] sm:$0xff] (%p1301_p5)  ;;  %v962_v12 = vld [vmem:[%s1438_s19 + $0x58] sm:$0xff] (%p1301_p5) }
  0xc8   : > { %504 = vst.msk [vmem:[%s1438_s19 + $0x78] sm:$0xff] %vm488_vm0, %v406_v47  ;;  %503 = vst.msk [vmem:[%s1438_s19 + $0x70] sm:$0xff] %vm488_vm0, %v401_v48  ;;  %v1032_v47 = vld [vmem:[%s1438_s19 + $0x170] sm:$0xff] (%p1301_p5)  ;;  %v1034_v48 = vld [vmem:[%s1438_s19 + $0x178] sm:$0xff] (%p1301_p5) }
  0xc9   : > { %961 = vst [vmem:[%s1656_s17 + $0xa0] sm:$0xff] (%p1301_p5), %v960_v11  ;;  %963 = vst [vmem:[%s1656_s17 + $0xb0] sm:$0xff] (%p1301_p5), %v962_v12 }
  0xca   : > { %1033 = vst [vmem:[%s1656_s17 + $0x2e0] sm:$0xff] (%p1301_p5), %v1032_v47  ;;  %1035 = vst [vmem:[%s1656_s17 + $0x2f0] sm:$0xff] (%p1301_p5), %v1034_v48 }
  0xcb   : > { %v416_v49 = vpop.permute.xlu1 %415  ;;  %v411_v50 = vpop.permute.xlu0 %410  ;;  %v964_v13 = vld [vmem:[%s1438_s19 + $0x60] sm:$0xff] (%p1301_p5)  ;;  %v966_v14 = vld [vmem:[%s1438_s19 + $0x68] sm:$0xff] (%p1301_p5) }
  0xcc   : > { %506 = vst.msk [vmem:[%s1438_s19 + $0x88] sm:$0xff] %vm488_vm0, %v416_v49  ;;  %505 = vst.msk [vmem:[%s1438_s19 + $0x80] sm:$0xff] %vm488_vm0, %v411_v50  ;;  %v1036_v49 = vld [vmem:[%s1438_s19 + $0x180] sm:$0xff] (%p1301_p5)  ;;  %v1038_v50 = vld [vmem:[%s1438_s19 + $0x188] sm:$0xff] (%p1301_p5) }
  0xcd   : > { %965 = vst [vmem:[%s1656_s17 + $0xc0] sm:$0xff] (%p1301_p5), %v964_v13  ;;  %967 = vst [vmem:[%s1656_s17 + $0xd0] sm:$0xff] (%p1301_p5), %v966_v14 }
  0xce   : > { %1037 = vst [vmem:[%s1656_s17 + $0x300] sm:$0xff] (%p1301_p5), %v1036_v49  ;;  %1039 = vst [vmem:[%s1656_s17 + $0x310] sm:$0xff] (%p1301_p5), %v1038_v50 }
  0xcf   : > { %v426_v51 = vpop.permute.xlu1 %425  ;;  %v421_v52 = vpop.permute.xlu0 %420  ;;  %v968_v15 = vld [vmem:[%s1438_s19 + $0x70] sm:$0xff] (%p1301_p5)  ;;  %v970_v16 = vld [vmem:[%s1438_s19 + $0x78] sm:$0xff] (%p1301_p5) }
  0xd0   : > { %508 = vst.msk [vmem:[%s1438_s19 + $0x98] sm:$0xff] %vm488_vm0, %v426_v51  ;;  %507 = vst.msk [vmem:[%s1438_s19 + $0x90] sm:$0xff] %vm488_vm0, %v421_v52  ;;  %v1040_v51 = vld [vmem:[%s1438_s19 + $0x190] sm:$0xff] (%p1301_p5)  ;;  %v1042_v52 = vld [vmem:[%s1438_s19 + $0x198] sm:$0xff] (%p1301_p5) }
  0xd1   : > { %969 = vst [vmem:[%s1656_s17 + $0xe0] sm:$0xff] (%p1301_p5), %v968_v15  ;;  %971 = vst [vmem:[%s1656_s17 + $0xf0] sm:$0xff] (%p1301_p5), %v970_v16 }
  0xd2   : > { %1041 = vst [vmem:[%s1656_s17 + $0x320] sm:$0xff] (%p1301_p5), %v1040_v51  ;;  %1043 = vst [vmem:[%s1656_s17 + $0x330] sm:$0xff] (%p1301_p5), %v1042_v52 }
  0xd3   : > { %v436_v53 = vpop.permute.xlu1 %435  ;;  %v431_v54 = vpop.permute.xlu0 %430  ;;  %v972_v17 = vld [vmem:[%s1438_s19 + $0x80] sm:$0xff] (%p1301_p5)  ;;  %v974_v18 = vld [vmem:[%s1438_s19 + $0x88] sm:$0xff] (%p1301_p5) }
  0xd4   : > { %510 = vst.msk [vmem:[%s1438_s19 + $0xa8] sm:$0xff] %vm488_vm0, %v436_v53  ;;  %509 = vst.msk [vmem:[%s1438_s19 + $0xa0] sm:$0xff] %vm488_vm0, %v431_v54  ;;  %v1044_v53 = vld [vmem:[%s1438_s19 + $0x1a0] sm:$0xff] (%p1301_p5)  ;;  %v1046_v54 = vld [vmem:[%s1438_s19 + $0x1a8] sm:$0xff] (%p1301_p5) }
  0xd5   : > { %973 = vst [vmem:[%s1656_s17 + $0x100] sm:$0xff] (%p1301_p5), %v972_v17  ;;  %975 = vst [vmem:[%s1656_s17 + $0x110] sm:$0xff] (%p1301_p5), %v974_v18 }
  0xd6   : > { %1045 = vst [vmem:[%s1656_s17 + $0x340] sm:$0xff] (%p1301_p5), %v1044_v53  ;;  %1047 = vst [vmem:[%s1656_s17 + $0x350] sm:$0xff] (%p1301_p5), %v1046_v54 }
  0xd7   : > { %v446_v55 = vpop.permute.xlu1 %445  ;;  %v441_v56 = vpop.permute.xlu0 %440  ;;  %v976_v19 = vld [vmem:[%s1438_s19 + $0x90] sm:$0xff] (%p1301_p5)  ;;  %v978_v20 = vld [vmem:[%s1438_s19 + $0x98] sm:$0xff] (%p1301_p5) }
  0xd8   : > { %512 = vst.msk [vmem:[%s1438_s19 + $0xb8] sm:$0xff] %vm488_vm0, %v446_v55  ;;  %511 = vst.msk [vmem:[%s1438_s19 + $0xb0] sm:$0xff] %vm488_vm0, %v441_v56  ;;  %v1048_v55 = vld [vmem:[%s1438_s19 + $0x1b0] sm:$0xff] (%p1301_p5)  ;;  %v1050_v56 = vld [vmem:[%s1438_s19 + $0x1b8] sm:$0xff] (%p1301_p5) }
  0xd9   : > { %977 = vst [vmem:[%s1656_s17 + $0x120] sm:$0xff] (%p1301_p5), %v976_v19  ;;  %979 = vst [vmem:[%s1656_s17 + $0x130] sm:$0xff] (%p1301_p5), %v978_v20 }
  0xda   : > { %1049 = vst [vmem:[%s1656_s17 + $0x360] sm:$0xff] (%p1301_p5), %v1048_v55  ;;  %1051 = vst [vmem:[%s1656_s17 + $0x370] sm:$0xff] (%p1301_p5), %v1050_v56 }
  0xdb   : > { %v456_v57 = vpop.permute.xlu1 %455  ;;  %v451_v58 = vpop.permute.xlu0 %450  ;;  %v980_v21 = vld [vmem:[%s1438_s19 + $0xa0] sm:$0xff] (%p1301_p5)  ;;  %v982_v22 = vld [vmem:[%s1438_s19 + $0xa8] sm:$0xff] (%p1301_p5) }
  0xdc   : > { %514 = vst.msk [vmem:[%s1438_s19 + $0xc8] sm:$0xff] %vm488_vm0, %v456_v57  ;;  %513 = vst.msk [vmem:[%s1438_s19 + $0xc0] sm:$0xff] %vm488_vm0, %v451_v58  ;;  %v1052_v57 = vld [vmem:[%s1438_s19 + $0x1c0] sm:$0xff] (%p1301_p5)  ;;  %v1054_v58 = vld [vmem:[%s1438_s19 + $0x1c8] sm:$0xff] (%p1301_p5) }
  0xdd   : > { %981 = vst [vmem:[%s1656_s17 + $0x140] sm:$0xff] (%p1301_p5), %v980_v21  ;;  %983 = vst [vmem:[%s1656_s17 + $0x150] sm:$0xff] (%p1301_p5), %v982_v22 }
  0xde   : > { %1053 = vst [vmem:[%s1656_s17 + $0x380] sm:$0xff] (%p1301_p5), %v1052_v57  ;;  %1055 = vst [vmem:[%s1656_s17 + $0x390] sm:$0xff] (%p1301_p5), %v1054_v58 }
  0xdf   : > { %v466_v59 = vpop.permute.xlu1 %465  ;;  %v461_v60 = vpop.permute.xlu0 %460  ;;  %v984_v23 = vld [vmem:[%s1438_s19 + $0xb0] sm:$0xff] (%p1301_p5)  ;;  %v986_v24 = vld [vmem:[%s1438_s19 + $0xb8] sm:$0xff] (%p1301_p5) }
  0xe0   : > { %516 = vst.msk [vmem:[%s1438_s19 + $0xd8] sm:$0xff] %vm488_vm0, %v466_v59  ;;  %515 = vst.msk [vmem:[%s1438_s19 + $0xd0] sm:$0xff] %vm488_vm0, %v461_v60  ;;  %v1056_v59 = vld [vmem:[%s1438_s19 + $0x1d0] sm:$0xff] (%p1301_p5)  ;;  %v1058_v60 = vld [vmem:[%s1438_s19 + $0x1d8] sm:$0xff] (%p1301_p5) }
  0xe1   : > { %985 = vst [vmem:[%s1656_s17 + $0x160] sm:$0xff] (%p1301_p5), %v984_v23  ;;  %987 = vst [vmem:[%s1656_s17 + $0x170] sm:$0xff] (%p1301_p5), %v986_v24 }
  0xe2   : > { %784 = sbr.rel (!%p1301_p5) target bundleno = 241 (0xf1), region = 70  ;;  %1057 = vst [vmem:[%s1656_s17 + $0x3a0] sm:$0xff] (%p1301_p5), %v1056_v59  ;;  %1059 = vst [vmem:[%s1656_s17 + $0x3b0] sm:$0xff] (%p1301_p5), %v1058_v60 }
  0xe3   : > { %v476_v61 = vpop.permute.xlu1 %475  ;;  %v471_v62 = vpop.permute.xlu0 %470  ;;  %v988_v25 = vld [vmem:[%s1438_s19 + $0xc0] sm:$0xff] (%p1301_p5)  ;;  %v990_v26 = vld [vmem:[%s1438_s19 + $0xc8] sm:$0xff] (%p1301_p5) }
  0xe4   : > { %518 = vst.msk [vmem:[%s1438_s19 + $0xe8] sm:$0xff] %vm488_vm0, %v476_v61  ;;  %517 = vst.msk [vmem:[%s1438_s19 + $0xe0] sm:$0xff] %vm488_vm0, %v471_v62  ;;  %v1060_v61 = vld [vmem:[%s1438_s19 + $0x1e0] sm:$0xff] (%p1301_p5)  ;;  %v1062_v62 = vld [vmem:[%s1438_s19 + $0x1e8] sm:$0xff] (%p1301_p5) }
  0xe5   : > { %989 = vst [vmem:[%s1656_s17 + $0x180] sm:$0xff] (%p1301_p5), %v988_v25  ;;  %991 = vst [vmem:[%s1656_s17 + $0x190] sm:$0xff] (%p1301_p5), %v990_v26 }
  0xe6   : > { %1061 = vst [vmem:[%s1656_s17 + $0x3c0] sm:$0xff] (%p1301_p5), %v1060_v61  ;;  %1063 = vst [vmem:[%s1656_s17 + $0x3d0] sm:$0xff] (%p1301_p5), %v1062_v62 }
  0xe7   : > { %v486_v63 = vpop.permute.xlu1 %485  ;;  %v481_v0 = vpop.permute.xlu0 %480  ;;  %v992_v27 = vld [vmem:[%s1438_s19 + $0xd0] sm:$0xff] (%p1301_p5)  ;;  %v994_v28 = vld [vmem:[%s1438_s19 + $0xd8] sm:$0xff] (%p1301_p5) }
  0xe8   : > { %520 = vst.msk [vmem:[%s1438_s19 + $0xf8] sm:$0xff] %vm488_vm0, %v486_v63  ;;  %519 = vst.msk [vmem:[%s1438_s19 + $0xf0] sm:$0xff] %vm488_vm0, %v481_v0  ;;  %v1064_v63 = vld [vmem:[%s1438_s19 + $0x1f0] sm:$0xff] (%p1301_p5)  ;;  %v1066_v0 = vld [vmem:[%s1438_s19 + $0x1f8] sm:$0xff] (%p1301_p5) }
  0xe9   : > { %993 = vst [vmem:[%s1656_s17 + $0x1a0] sm:$0xff] %v992_v27  ;;  %995 = vst [vmem:[%s1656_s17 + $0x1b0] sm:$0xff] %v994_v28 }
  0xea   : > { %1065 = vst [vmem:[%s1656_s17 + $0x3e0] sm:$0xff] %v1064_v63  ;;  %1067 = vst [vmem:[%s1656_s17 + $0x3f0] sm:$0xff] %v1066_v0 }
  0xeb   : > { %v996_v29 = vld [vmem:[%s1438_s19 + $0xe0] sm:$0xff]  ;;  %v998_v30 = vld [vmem:[%s1438_s19 + $0xe8] sm:$0xff] }
  0xec   : > { %997 = vst [vmem:[%s1656_s17 + $0x1c0] sm:$0xff] %v996_v29  ;;  %999 = vst [vmem:[%s1656_s17 + $0x1d0] sm:$0xff] %v998_v30 }
  0xef   : > { %v1000_v31 = vld [vmem:[%s1438_s19 + $0xf0] sm:$0xff]  ;;  %v1002_v32 = vld [vmem:[%s1438_s19 + $0xf8] sm:$0xff] }
  0xf0   : > { %1001 = vst [vmem:[%s1656_s17 + $0x1e0] sm:$0xff] %v1000_v31  ;;  %1003 = vst [vmem:[%s1656_s17 + $0x1f0] sm:$0xff] %v1002_v32 }
  0xf1 PF: > { %p9_p10 = scmp.ge.s32.totalorder %s1288_s13, 4   ;;  %s1797_s9 = smov %s1249_s10 }
  0xf2   : > { %s1798_s10 = smov %s1299_s16  ;;  %s1799_s11 = smov %s1288_s13 }
  0xf3   :  { %11 = sbr.rel (!%p9_p10) target bundleno = 2 (0x2), region = 140 }

</bundles_post_ra>
